<compile_context>
chip_gen: v6e
topology: v6e:2x2x1
jax: 0.10.0
libtpu: 0.0.40
codegen_flags: <defaults>
</compile_context>

<pallas_src>
import functools

import jax
import jax.numpy as jnp
from jax.experimental import pallas as pl
from jax.experimental.pallas import tpu as pltpu


def _round_up(x, m):
    return ((x + m - 1) // m) * m


def _pick_block_b(batch, per_elem_bytes, budget_bytes):
    """Largest divisor of `batch` whose (double-buffered) tiles fit the VMEM budget."""
    best = 1
    for cand in range(1, batch + 1):
        if batch % cand == 0 and cand * per_elem_bytes <= budget_bytes:
            best = cand
    return best


def _memory_pooling_kernel(node_ref, adj_ref, poison_ref, lw_ref, lb_ref,
                           nn_ref, na_ref, *, n_out):
    TB = node_ref.shape[0]
    Dp = nn_ref.shape[2]          # lane-padded D_out
    Np = na_ref.shape[2]          # lane-padded N_out

    # C == 1 after the size-1-channel softmax, so pooling is a plain reduction.
    node = node_ref[...].astype(jnp.float32)                     # (TB, N_in, D_in)
    row_sum = jnp.sum(node, axis=1)                              # (TB, D_in)

    adj = adj_ref[...].astype(jnp.float32)                       # (TB, N_in, N_in)
    adj_sum = jnp.sum(jnp.sum(adj, axis=2), axis=1, keepdims=True)   # (TB, 1)

    # Cheap NaN/Inf propagation: per-batch node poison + grid-invariant parameter poison.
    poison = poison_ref[0, 0] + 0.0 * jnp.sum(row_sum, axis=1, keepdims=True)  # (TB, 1)

    # new_node_set rows: (sum_n node[b]) @ W + b, LeakyReLU(0.01), broadcast over N_out.
    feats = jnp.dot(row_sum + poison, lw_ref[...],
                    preferred_element_type=jnp.float32) + lb_ref[...]          # (TB, Dp)
    feats = jnp.where(feats >= 0.0, feats, 0.01 * feats)
    nn_ref[...] = jnp.broadcast_to(feats[:, None, :], (TB, n_out, Dp)).astype(nn_ref.dtype)

    # new_adj entries: sum(adj[b]) broadcast over (N_out, N_out); padded lanes carry the
    # same value (lane-dense unmasked store) and are sliced off in the wrapper.
    adj_val = adj_sum + poison                                                 # (TB, 1)
    na_ref[...] = jnp.broadcast_to(adj_val[:, :, None], (TB, n_out, Np)).astype(na_ref.dtype)


def memory_pooling_forward(node_set, adj, centroids, conv_w, conv_b,
                           lin_w_t, lin_b, *, tau=1.0, block_b=None,
                           vmem_tile_budget_bytes=32 * 1024 * 1024):
    # NOTE: node_set / adj are NOT upcast here -- they stream HBM->VMEM in their native
    # dtype (pass bf16 to halve the dominant HBM traffic); kernel arithmetic is f32.
    del tau  # a Python float; it never changes the output (C collapses to 1) and carries no NaN.

    B, N_in, D_in = node_set.shape
    heads, N_out, _ = centroids.shape
    D_out = lin_w_t.shape[1]

    Dp = _round_up(D_out, 128)
    Np = _round_up(N_out, 128)

    # Lane-padded linear weight / bias (padded columns stay exactly 0 through LeakyReLU).
    lw = jnp.zeros((D_in, Dp), jnp.float32).at[:, :D_out].set(lin_w_t.astype(jnp.float32))
    lb = jnp.zeros((1, Dp), jnp.float32).at[:, :D_out].set(
        lin_b.reshape(1, D_out).astype(jnp.float32))

    # Grid-invariant poison scalar so NaN/Inf in the (output-dead) centroid / conv
    # parameters still poisons the outputs; computed once, read from SMEM.
    param_poison = (0.0 * (jnp.sum(centroids.astype(jnp.float32))
                           + jnp.sum(conv_w.astype(jnp.float32))
                           + jnp.sum(conv_b.astype(jnp.float32)))).reshape(1, 1)

    # Batch block from a VMEM budget: double-buffered node/adj inputs + padded outputs.
    per_elem = 2 * (N_in * D_in * node_set.dtype.itemsize
                    + N_in * N_in * adj.dtype.itemsize
                    + N_out * Dp * 4 + N_out * Np * 4)
    TB = _pick_block_b(B, per_elem, vmem_tile_budget_bytes) if block_b is None else block_b
    assert B % TB == 0, "block_b must divide the batch size"

    weight_bytes = 2 * (D_in * Dp + Dp) * 4
    vmem_limit = int(min(50 << 20, max(16 << 20, TB * per_elem + weight_bytes + (2 << 20))))

    kernel = functools.partial(_memory_pooling_kernel, n_out=N_out)

    grid_spec = pltpu.PrefetchScalarGridSpec(
        num_scalar_prefetch=0,
        grid=(B // TB,),
        in_specs=[
            pl.BlockSpec((TB, N_in, D_in), lambda b: (b, 0, 0)),
            pl.BlockSpec((TB, N_in, N_in), lambda b: (b, 0, 0)),
            pl.BlockSpec(memory_space=pltpu.MemorySpace.SMEM),   # poison scalar (1, 1)
            pl.BlockSpec((D_in, Dp), lambda b: (0, 0)),
            pl.BlockSpec((1, Dp), lambda b: (0, 0)),
        ],
        out_specs=[
            pl.BlockSpec((TB, N_out, Dp), lambda b: (b, 0, 0)),
            pl.BlockSpec((TB, N_out, Np), lambda b: (b, 0, 0)),
        ],
    )

    nn_pad, na_pad = pl.pallas_call(
        kernel,
        out_shape=(jax.ShapeDtypeStruct((B, N_out, Dp), jnp.float32),
                   jax.ShapeDtypeStruct((B, N_out, Np), jnp.float32)),
        grid_spec=grid_spec,
        compiler_params=pltpu.CompilerParams(
            dimension_semantics=("parallel",),
            vmem_limit_bytes=vmem_limit),
    )(node_set, adj, param_poison, lw, lb)

    new_nodes = nn_pad if Dp == D_out else nn_pad[:, :, :D_out]
    new_adj = na_pad if Np == N_out else na_pad[:, :, :N_out]
    return new_nodes, new_adj


def reference_forward(node_set, adj, centroids, conv_w, conv_b, lin_w_t, lin_b, tau=1.0):
    """Pure-JAX mirror of the PyTorch forward (full pipeline), for verification."""
    hp = jax.lax.Precision.HIGHEST
    B = node_set.shape[0]
    bc = jnp.broadcast_to(centroids[None], (B,) + centroids.shape)       # (B,H,M,D)
    ns = node_set[:, None, None, :, :]                                   # (B,1,1,N,D)
    bce = bc[:, :, :, None, :]                                           # (B,H,M,1,D)
    dist = jnp.sum(jnp.abs(ns - bce) ** 2, axis=4)                       # (B,H,M,N)
    c_heads = jnp.power(1.0 + dist / tau, -(tau + 1.0) / 2.0)
    c_heads = c_heads / jnp.sum(c_heads, axis=2, keepdims=True)
    C = jnp.einsum('bhmn,h->bmn', c_heads, conv_w[0], precision=hp) + conv_b[0, 0]
    C = jax.nn.softmax(C[:, None], axis=1)[:, 0]                         # softmax over size-1 axis
    new_nodes = jnp.einsum('bmn,bnd->bmd', C, node_set, precision=hp)
    new_nodes = jnp.matmul(new_nodes, lin_w_t, precision=hp) + lin_b[0]
    new_nodes = jnp.where(new_nodes >= 0, new_nodes, 0.01 * new_nodes)
    q_adj = jnp.einsum('bmn,bnk->bmk', C, adj, precision=hp)
    new_adj = jnp.einsum('bmn,bkn->bmk', q_adj, C, precision=hp)
    return new_nodes, new_adj


if __name__ == "__main__":
    # Small shapes consistent with the module.
    B, N_in, D_in = 2, 16, 32
    heads, N_out, D_out = 4, 8, 24
    tau = 1.0

    key = jax.random.PRNGKey(0)
    k = jax.random.split(key, 8)

    node_set = jax.random.normal(k[0], (B, N_in, D_in), dtype=jnp.float32)
    adj = (jax.random.uniform(k[1], (B, N_in, N_in), dtype=jnp.float32) > 0.5
           ).astype(jnp.float32)

    # Deterministic parameter init (shapes from the module's __init__).
    centroids = 2.0 * jax.random.uniform(k[2], (heads, N_out, D_in), dtype=jnp.float32) - 1.0
    conv_w = jax.random.normal(k[3], (1, heads), dtype=jnp.float32) * 0.5   # Conv2d(H,1,[1,1]) weight
    conv_b = jax.random.normal(k[4], (1, 1), dtype=jnp.float32) * 0.1       # Conv2d bias
    lin_w_t = jax.random.normal(k[5], (D_in, D_out), dtype=jnp.float32) * (1.0 / jnp.sqrt(D_in))
    lin_b = jax.random.normal(k[6], (1, D_out), dtype=jnp.float32) * 0.1

    new_nodes, new_adj = memory_pooling_forward(
        node_set, adj, centroids, conv_w, conv_b, lin_w_t, lin_b, tau=tau)
    jax.block_until_ready((new_nodes, new_adj))

    ref_nodes, ref_adj = reference_forward(
        node_set, adj, centroids, conv_w, conv_b, lin_w_t, lin_b, tau=tau)

    assert new_nodes.shape == (B, N_out, D_out)
    assert new_adj.shape == (B, N_out, N_out)
    assert jnp.allclose(new_nodes, ref_nodes, rtol=1e-5, atol=1e-5)
    assert jnp.allclose(new_adj, ref_adj, rtol=1e-5, atol=1e-5)

    print("KERNEL_OK")
</pallas_src>

<mosaic_0001>
module attributes {stable_mosaic.version = 11 : i64} {
  func.func @_memory_pooling_kernel(%arg0: i32, %arg1: memref<2x16x32xf32, #tpu.memory_space<vmem>>, %arg2: memref<2x16x16xf32, #tpu.memory_space<vmem>>, %arg3: memref<1x1xf32, #tpu.memory_space<smem>>, %arg4: memref<32x128xf32, #tpu.memory_space<vmem>>, %arg5: memref<1x128xf32, #tpu.memory_space<vmem>>, %arg6: memref<2x8x128xf32, #tpu.memory_space<vmem>>, %arg7: memref<2x8x128xf32, #tpu.memory_space<vmem>>) attributes {dimension_semantics = [#tpu.dimension_semantics<parallel>], iteration_bounds = array<i64: 1>, scalar_prefetch = 0 : i64, scratch_operands = 0 : i64, tpu.core_type = #tpu.core_type<tc>, window_params = [{transform_indices = @transform_0, window_bounds = array<i64: 2, 16, 32>}, {transform_indices = @transform_1, window_bounds = array<i64: 2, 16, 16>}, {transform_indices = @transform_2, window_bounds = array<i64: 1, 1>}, {pipeline_mode = #tpu.pipeline_mode<synchronous>, transform_indices = @transform_3, window_bounds = array<i64: 32, 128>}, {pipeline_mode = #tpu.pipeline_mode<synchronous>, transform_indices = @transform_4, window_bounds = array<i64: 1, 128>}, {transform_indices = @transform_5, window_bounds = array<i64: 2, 8, 128>}, {transform_indices = @transform_6, window_bounds = array<i64: 2, 8, 128>}]} {
    %c0 = arith.constant 0 : index
    %c0_0 = arith.constant 0 : index
    %c0_1 = arith.constant 0 : index
    %0 = vector.load %arg1[%c0, %c0_0, %c0_1] : memref<2x16x32xf32, #tpu.memory_space<vmem>>, vector<2x16x32xf32>
    %cst = arith.constant dense<0.000000e+00> : vector<2x32xf32>
    %1 = vector.multi_reduction <add>, %0, %cst [1] : vector<2x16x32xf32> to vector<2x32xf32>
    %c0_2 = arith.constant 0 : index
    %c0_3 = arith.constant 0 : index
    %c0_4 = arith.constant 0 : index
    %2 = vector.load %arg2[%c0_2, %c0_3, %c0_4] : memref<2x16x16xf32, #tpu.memory_space<vmem>>, vector<2x16x16xf32>
    %cst_5 = arith.constant dense<0.000000e+00> : vector<2x16xf32>
    %3 = vector.multi_reduction <add>, %2, %cst_5 [2] : vector<2x16x16xf32> to vector<2x16xf32>
    %cst_6 = arith.constant dense<0.000000e+00> : vector<2xf32>
    %4 = vector.multi_reduction <add>, %3, %cst_6 [1] : vector<2x16xf32> to vector<2xf32>
    %5 = vector.shape_cast %4 : vector<2xf32> to vector<2x1xf32>
    %c0_7 = arith.constant 0 : index
    %c0_8 = arith.constant 0 : index
    %6 = memref.load %arg3[%c0_7, %c0_8] : memref<1x1xf32, #tpu.memory_space<smem>>
    %cst_9 = arith.constant dense<0.000000e+00> : vector<2xf32>
    %7 = vector.multi_reduction <add>, %1, %cst_9 [1] : vector<2x32xf32> to vector<2xf32>
    %8 = vector.shape_cast %7 : vector<2xf32> to vector<2x1xf32>
    %cst_10 = arith.constant 0.000000e+00 : f32
    %9 = vector.broadcast %cst_10 : f32 to vector<2x1xf32>
    %10 = arith.mulf %9, %8 : vector<2x1xf32>
    %11 = vector.broadcast %6 : f32 to vector<2x1xf32>
    %12 = arith.addf %11, %10 : vector<2x1xf32>
    %13 = vector.broadcast %12 : vector<2x1xf32> to vector<2x32xf32>
    %14 = arith.addf %1, %13 : vector<2x32xf32>
    %c0_11 = arith.constant 0 : index
    %c0_12 = arith.constant 0 : index
    %15 = vector.load %arg4[%c0_11, %c0_12] : memref<32x128xf32, #tpu.memory_space<vmem>>, vector<32x128xf32>
    %cst_13 = arith.constant dense<0.000000e+00> : vector<2x128xf32>
    %16 = tpu.matmul %14, %15, %cst_13 {dimension_numbers = #tpu.dot_dimension_numbers<[1], [0], [0], [1], [0, 0, 1, 1], [], []>} : vector<2x32xf32>, vector<32x128xf32>, vector<2x128xf32> -> vector<2x128xf32>
    %c0_14 = arith.constant 0 : index
    %c0_15 = arith.constant 0 : index
    %17 = vector.load %arg5[%c0_14, %c0_15] : memref<1x128xf32, #tpu.memory_space<vmem>>, vector<1x128xf32>
    %18 = vector.broadcast %17 : vector<1x128xf32> to vector<2x128xf32>
    %19 = arith.addf %16, %18 : vector<2x128xf32>
    %cst_16 = arith.constant 0.000000e+00 : f32
    %20 = vector.broadcast %cst_16 : f32 to vector<2x128xf32>
    %21 = arith.cmpf oge, %19, %20 : vector<2x128xf32>
    %cst_17 = arith.constant 0.00999999977 : f32
    %22 = vector.broadcast %cst_17 : f32 to vector<2x128xf32>
    %23 = arith.mulf %22, %19 : vector<2x128xf32>
    %24 = arith.select %21, %19, %23 : vector<2x128xi1>, vector<2x128xf32>
    %25 = vector.shape_cast %24 : vector<2x128xf32> to vector<2x1x128xf32>
    %26 = vector.shape_cast %25 : vector<2x1x128xf32> to vector<2x1x128xf32>
    %27 = vector.broadcast %26 : vector<2x1x128xf32> to vector<2x8x128xf32>
    %c0_18 = arith.constant 0 : index
    %c0_19 = arith.constant 0 : index
    %c0_20 = arith.constant 0 : index
    %28 = vector.load %arg6[%c0_18, %c0_19, %c0_20] : memref<2x8x128xf32, #tpu.memory_space<vmem>>, vector<2x8x128xf32>
    tpu.vector_store %arg6[%c0_18, %c0_19, %c0_20], %27 {strides = array<i32>} : memref<2x8x128xf32, #tpu.memory_space<vmem>>, vector<2x8x128xf32>,
    %29 = arith.addf %5, %12 : vector<2x1xf32>
    %30 = vector.shape_cast %29 : vector<2x1xf32> to vector<2x1x1xf32>
    %31 = vector.shape_cast %30 : vector<2x1x1xf32> to vector<2x1x1xf32>
    %32 = vector.broadcast %31 : vector<2x1x1xf32> to vector<2x8x128xf32>
    %c0_21 = arith.constant 0 : index
    %c0_22 = arith.constant 0 : index
    %c0_23 = arith.constant 0 : index
    %33 = vector.load %arg7[%c0_21, %c0_22, %c0_23] : memref<2x8x128xf32, #tpu.memory_space<vmem>>, vector<2x8x128xf32>
    tpu.vector_store %arg7[%c0_21, %c0_22, %c0_23], %32 {strides = array<i32>} : memref<2x8x128xf32, #tpu.memory_space<vmem>>, vector<2x8x128xf32>,
    return
  }
  func.func @transform_0(%arg0: i32) -> (i32, i32, i32) {
    %c0_i32 = arith.constant 0 : i32
    %c0_i32_0 = arith.constant 0 : i32
    %c0_i32_1 = arith.constant 0 : i32
    return %arg0, %c0_i32, %c0_i32_0 : i32, i32, i32
  }
  func.func @transform_1(%arg0: i32) -> (i32, i32, i32) {
    %c0_i32 = arith.constant 0 : i32
    %c0_i32_0 = arith.constant 0 : i32
    %c0_i32_1 = arith.constant 0 : i32
    return %arg0, %c0_i32, %c0_i32_0 : i32, i32, i32
  }
  func.func @transform_2(%arg0: i32) -> (i32, i32) {
    %c0_i32 = arith.constant 0 : i32
    %c0_i32_0 = arith.constant 0 : i32
    %c0_i32_1 = arith.constant 0 : i32
    return %c0_i32, %c0_i32_0 : i32, i32
  }
  func.func @transform_3(%arg0: i32) -> (i32, i32) {
    %c0_i32 = arith.constant 0 : i32
    %c0_i32_0 = arith.constant 0 : i32
    %c0_i32_1 = arith.constant 0 : i32
    return %c0_i32, %c0_i32_0 : i32, i32
  }
  func.func @transform_4(%arg0: i32) -> (i32, i32) {
    %c0_i32 = arith.constant 0 : i32
    %c0_i32_0 = arith.constant 0 : i32
    %c0_i32_1 = arith.constant 0 : i32
    return %c0_i32, %c0_i32_0 : i32, i32
  }
  func.func @transform_5(%arg0: i32) -> (i32, i32, i32) {
    %c0_i32 = arith.constant 0 : i32
    %c0_i32_0 = arith.constant 0 : i32
    %c0_i32_1 = arith.constant 0 : i32
    return %arg0, %c0_i32, %c0_i32_0 : i32, i32, i32
  }
  func.func @transform_6(%arg0: i32) -> (i32, i32, i32) {
    %c0_i32 = arith.constant 0 : i32
    %c0_i32_0 = arith.constant 0 : i32
    %c0_i32_1 = arith.constant 0 : i32
    return %arg0, %c0_i32, %c0_i32_0 : i32, i32, i32
  }
}

</mosaic_0001>

<bundles_post_ra>
// kernel: tpu_custom_call.1
= control target key start
LH: loop header
LB: loop body
LE: loop exit
PB: predicated region body
PF: predicated region fallthrough
CT: control target
= control target key end

     0   :  { %13 = vsyncpa [#allocation4], 0  ;;  %s559_s0 = inlined_call_operand.hbm [shape: f32[2,16,32], index: 0, kind: input, shape index: {}]   ;;  %s560_s1 = inlined_call_operand.hbm [shape: f32[2,16,16], index: 1, kind: input, shape index: {}]   ;;  %s561_s2 = inlined_call_operand.<no memory space> [shape: f32[1,1], index: 2, kind: input, shape index: {}]   ;;  %s562_s3 = inlined_call_operand.hbm [shape: f32[32,128], index: 3, kind: input, shape index: {}]   ;;  %s563_s4 = inlined_call_operand.vmem [shape: f32[1,128], index: 4, kind: input, shape index: {}]   ;;  %s564_s5 = inlined_call_operand.hbm [shape: f32[2,8,128], index: 5, kind: output, shape index: {0}]   ;;  %s565_s6 = inlined_call_operand.hbm [shape: f32[2,8,128], index: 6, kind: output, shape index: {1}]  }
   0x1   :  { %14 = vsyncpa [#allocation7], 0 }
   0x2   :  { %15 = vsyncpa [#allocation5], 0 }
   0x3   :  { %16 = vsyncpa [#allocation11], 0  ;;  %s466_s21 = smov [#allocation6]   ;;  %s467_s23 = smov [#allocation3]  }
   0x4   :  { %s34_s22 = sshll.u32 %s466_s21, 4  ;;  %s22_s24 = sshll.u32 %s467_s23, 4  ;;  %s35_s22 = int_to_ptr.vmem [resolvable:$true] %s34_s22  ;;  %s23_s24 = int_to_ptr.vmem [resolvable:$true] %s22_s24 }
   0x5   :  { %s366_s25 = scalar_lea.vmem %s35_s22, 512  ;;  %p371_p1 = scmp.lt.s32.totalorder %s35_s22, %s35_s22 }
   0x6   :  { %p367_p0 = scmp.ne.s32.totalorder %s35_s22, %s366_s25  ;;  %p372_p2 = scmp.lt.s32.totalorder %s366_s25, %s366_s25 }
   0x8   :  { %p373_p3 = por %p372_p2, %p371_p1 }
   0xa   :  { %p374_p4 = pnand %p373_p3, %p367_p0 }
   0xc   :  { %377 = shalt.err (!%p374_p4)
}
   0xd   :  { %s468_s26 = smov 128   ;;  %s469_s27 = smov 8  }
   0xe   :  { %40 = dma.hbm_to_vmem [thread:$0]  %s560_s1, 512, %s35_s22, [#allocation7], %s468_s26, %s468_s26, %s469_s27  }
   0xf   :  { %s386_s30 = scalar_lea.vmem %s23_s24, 512  ;;  %p391_p6 = scmp.lt.s32.totalorder %s23_s24, %s23_s24 }
  0x10   :  { %p387_p5 = scmp.ne.s32.totalorder %s23_s24, %s386_s30  ;;  %p392_p7 = scmp.lt.s32.totalorder %s386_s30, %s386_s30 }
  0x12   :  { %p393_p8 = por %p392_p7, %p391_p6 }
  0x14   :  { %p394_p9 = pnand %p393_p8, %p387_p5 }
  0x16   :  { %397 = shalt.err (!%p394_p9)
}
  0x17   :  { %28 = dma.hbm_to_vmem [thread:$0]  %s559_s0, 512, %s23_s24, [#allocation4], %s468_s26, %s468_s26, %s469_s27  }
  0x18   :  { %s470_s9 = smov [#allocation8]  }
  0x19   :  { %s48_s10 = sshll.u32 %s470_s9, 4  ;;  %s49_s10 = int_to_ptr.vmem [resolvable:$true] %s48_s10 }
  0x1a   :  { %s406_s11 = scalar_lea.vmem %s49_s10, 512  ;;  %p411_p11 = scmp.lt.s32.totalorder %s49_s10, %s49_s10 }
  0x1b   :  { %p407_p10 = scmp.ne.s32.totalorder %s49_s10, %s406_s11  ;;  %p412_p12 = scmp.lt.s32.totalorder %s406_s11, %s406_s11 }
  0x1d   :  { %p413_p13 = por %p412_p12, %p411_p11 }
  0x1f   :  { %p414_p0 = pnand %p413_p13, %p407_p10 }
  0x21   :  { %417 = shalt.err (!%p414_p0)
}
  0x22   :  { %54 = dma.hbm_to_vmem [thread:$0]  %s562_s3, 512, %s49_s10, [#allocation7], %s468_s26, %s468_s26, %s469_s27  }
  0x23   :  { %458 = dma.done.wait [#allocation4], 512  }
  0x24   :  { %459 = vsyncadd [#allocation4], 4294966784 }
  0x25   :  { %460 = dma.done.wait [#allocation7], 1024  }
  0x26   :  { %461 = vsyncadd [#allocation7], 4294966272  ;;  %vm70_vm0 = vcmask 261120   ;;  %vm93_vm1 = vcmask 130048   ;;  %v66_v0 = vld [vmem:[#allocation3] sm:$0xff]  ;;  %v67_v1 = vld [vmem:[#allocation3 + $0x8] sm:$0xff]  ;;  %v110_v37 = vlaneseq  ;;  %v149_v42 = vstv %s561_s2 }
  0x27   :  { %v68_v2 = vld [vmem:[#allocation3 + $0x10] sm:$0xff]  ;;  %v69_v3 = vld [vmem:[#allocation3 + $0x18] sm:$0xff]  ;;  %v71_v4 = vsel %vm70_vm0, %v66_v0, 0.0  ;;  %v72_v5 = vsel %vm70_vm0, %v67_v1, 0.0  ;;  %v90_v7 = vld [vmem:[#allocation6 + $0x8] sm:$0xff]  ;;  %vm132_vm2 = vcmask 1041409  }
  0x28   :  { %v80_v6 = vsel %vm70_vm0, %v68_v2, 0.0  ;;  %v73_v8 = vadd.f32 %v72_v5, %v71_v4  ;;  %v81_v9 = vsel %vm70_vm0, %v69_v3, 0.0  ;;  %v97_v10 = vsel %vm93_vm1, %v90_v7, 0.0  ;;  %v91_v11 = vld [vmem:[#allocation6 + $0x10] sm:$0xff]  ;;  %v89_v27 = vld [vmem:[#allocation6] sm:$0xff]  ;;  %v92_v30 = vld [vmem:[#allocation6 + $0x18] sm:$0xff] }
  0x29   :  { %v82_v12 = vadd.f32 %v81_v9, %v80_v6  ;;  %98 = vadd.xlane.f32.xlu1 %v97_v10  ;;  %v100_v14 = vsel %vm93_vm1, %v91_v11, 0.0  ;;  %vm144_vm3 = vcmask 254976   ;;  %v94_v29 = vsel %vm93_vm1, %v89_v27, 0.0  ;;  %v160_v33 = vld [vmem:[#allocation8 + $0x18] sm:$0xff]  ;;  %v159_v34 = vld [vmem:[#allocation8 + $0x10] sm:$0xff]  ;;  %v158_v35 = vld [vmem:[#allocation8 + $0x8] sm:$0xff] }
  0x2a   :  { %v74_v13 = vrot.slane %v73_v8, 4  ;;  %v103_v31 = vsel %vm93_vm1, %v92_v30, 0.0  ;;  %v471_v32 = vmov 0.0   ;;  %v157_v36 = vld [vmem:[#allocation8] sm:$0xff]  ;;  %vm472_vm4 = vmmov 0   ;;  %s473_s2 = smov [#allocation10]  }
  0x2b   :  { %v83_v15 = vrot.slane %v82_v12, 4  ;;  %337 = vmatprep.subr.mxu0 %v471_v32  ;;  %345 = vmatprep.mubr.msk.f32.mxu0 %vm472_vm4, %v471_v32  ;;  %v111_v38 = vand.u32 127, %v110_v37  ;;  %v113_v39 = vshrl.u32 %v110_v37, 7  ;;  %vm121_vm5 = vcmask 130112   ;;  %s313_s13 = sshll.u32 %s473_s2, 4  ;;  %s314_s13 = int_to_ptr.vmem [resolvable:$true] %s313_s13 }
  0x2c   :  { %v75_v16 = vadd.f32 %v74_v13, %v73_v8  ;;  %338 = vmatpush3.msra.mxu0 %v160_v33  ;;  %vm135_vm6 = vcmask 123904   ;;  %s418_s14 = scalar_lea.vmem %s314_s13, 256  ;;  %p423_p2 = scmp.lt.s32.totalorder %s314_s13, %s314_s13 }
  0x2d   :  { %v84_v17 = vadd.f32 %v83_v15, %v82_v12  ;;  %101 = vadd.xlane.f32.xlu1 %v100_v14  ;;  %339 = vmatprep.subr.mxu0 %v471_v32  ;;  %v116_v40 = vadd.s32 4294967288, %v111_v38  ;;  %v114_v46 = vsub.s32 %v111_v38, %v113_v39  ;;  %v272_v0 = vsub.s32 0, %v113_v39  ;;  %p419_p1 = scmp.ne.s32.totalorder %s314_s13, %s418_s14  ;;  %p424_p3 = scmp.lt.s32.totalorder %s418_s14, %s418_s14 }
  0x2e   :  { %v76_v18 = vrot.slane %v75_v16, 2  ;;  %340 = vmatpush3.msra.mxu0 %v159_v34  ;;  %v290_v1 = vsub.s32 1, %v113_v39 }
  0x2f   :  { %v85_v19 = vrot.slane %v84_v17, 2  ;;  %341 = vmatprep.subr.mxu0 %v471_v32  ;;  %v119_v45 = vsub.s32 %v116_v40, %v113_v39  ;;  %p425_p4 = por %p424_p3, %p423_p2 }
  0x30   :  { %v77_v20 = vadd.f32 %v76_v18, %v75_v16  ;;  %342 = vmatpush3.msra.mxu0 %v158_v35 }
  0x31   :  { %v86_v21 = vadd.f32 %v85_v19, %v84_v17  ;;  %343 = vmatprep.subr.mxu0 %v471_v32  ;;  %p426_p5 = pnand %p425_p4, %p419_p1 }
  0x32   :  { %v78_v22 = vrot.slane %v77_v20, 1  ;;  %344 = vmatpush3.msra.mxu0 %v157_v36 }
  0x33   :  { %v87_v23 = vrot.slane %v86_v21, 1 }
  0x34   :  { %v79_v24 = vadd.f32 %v78_v22, %v77_v20 }
  0x35   :  { %v88_v25 = vadd.f32 %v87_v23, %v86_v21 }
  0x37   :  { %v142_v26 = vsel %vm132_vm2, %v88_v25, %v79_v24 }
  0x38   :  { %v145_v28 = vsel %vm144_vm3, %v142_v26, 0.0 }
  0x39   :  { %146 = vadd.xlane.f32.xlu0 %v145_v28 }
  0x3d   :  { %95 = vadd.xlane.f32.xlu0 %v94_v29 }
  0x41   :  { %104 = vadd.xlane.f32.xlu0 %v103_v31 }
  0xb2   :  { %v99_v41 = vpop.xlane.xlu1 %98 }
  0xb3   :  { %v120_v51 = vrot.slane %v99_v41, %v119_v45 }
  0xb6   :  { %v102_v49 = vpop.xlane.xlu1 %101 }
  0xb7   :  { %v126_v53 = vrot.slane %v102_v49, %v114_v46 }
  0xc2   :  { %v147_v43 = vpop.xlane.xlu0 %146 }
  0xc3   :  { %v148_v44 = vmul.f32 0.0, %v147_v43 }
  0xc5   :  { %v150_v47 = vadd.f32 %v149_v42, %v148_v44 }
  0xc6   :  { %v96_v48 = vpop.xlane.xlu0 %95 }
  0xc7   :  { %v152_v50 = vrot.slane %v150_v47, 1  ;;  %v115_v52 = vrot.slane %v96_v48, %v114_v46  ;;  %v155_v56 = vadd.f32 %v150_v47, %v79_v24 }
  0xc9   :  { %v156_v54 = vadd.f32 %v152_v50, %v88_v25  ;;  %v122_v59 = vsel %vm121_vm5, %v120_v51, %v115_v52 }
  0xca   :  { %v105_v55 = vpop.xlane.xlu0 %104 }
  0xcb   :  { %v130_v57 = vrot.slane %v105_v55, %v119_v45  ;;  %v170_v58 = vrot.slane %v156_v54, 7 }
  0xcd   :  { %v171_v60 = vsel %vm132_vm2, %v170_v58, %v155_v56  ;;  %v131_v61 = vsel %vm121_vm5, %v130_v57, %v126_v53 }
  0xce   :  { %346 = vmatmul.mubr.msk.f32.vlgmr.msra.gmra.mxu0 %vm70_vm0, %v171_v60  ;;  %v133_v62 = vsel %vm132_vm2, %v131_v61, %v122_v59 }
  0xcf   :  { %v136_v63 = vsel %vm135_vm6, %v133_v62, 0.0 }
  0xd0   :  { %137 = vadd.xlane.f32.xlu1 %v136_v63 }
 0x159   :  { %v138_v2 = vpop.xlane.xlu1 %137 }
 0x15a   :  { %v282_v3 = vadd.f32 %v150_v47, %v138_v2 }
 0x15c   :  { %v287_v4 = vrot.slane %v282_v3, %v272_v0  ;;  %v291_v5 = vrot.slane %v282_v3, %v290_v1 }
 0x15e   :  { %294 = vst [vmem:[#allocation10] sm:$0xff] %v287_v4  ;;  %295 = vst [vmem:[#allocation10 + $0x8] sm:$0xff] %v291_v5 }
 0x15f   :  { %429 = shalt.err (!%p426_p5)
}
 0x160   :  { %319 = dma.vmem_to_hbm [thread:$0]  %s314_s13, 256, %s565_s6, [#allocation11], %s468_s26, %s468_s26, %s469_s27   ;;  %v474_v6 = vmov 1966171168  }
 0x161   :  { %v249_v7 = vunpack.c.l.s4 %v474_v6  ;;  %v330_v8 = vld [vmem:[%s563_s4] ss:$0 sm:$0xff]  ;;  %s475_s19 = smov [#allocation9]  }
 0x162   :  { %s301_s20 = sshll.u32 %s475_s19, 4  ;;  %s302_s20 = int_to_ptr.vmem [resolvable:$true] %s301_s20 }
 0x163   :  { %v250_v9 = vunpack.c.0.s8 %v249_v7  ;;  %s438_s4 = scalar_lea.vmem %s302_s20, 256  ;;  %p443_p7 = scmp.lt.s32.totalorder %s302_s20, %s302_s20 }
 0x164   :  { %p439_p6 = scmp.ne.s32.totalorder %s302_s20, %s438_s4  ;;  %p444_p8 = scmp.lt.s32.totalorder %s438_s4, %s438_s4 }
 0x165   :  { %v253_v12 = vsub.s32 %v250_v9, %v113_v39 }
 0x166   :  { %p445_p9 = por %p444_p8, %p443_p7 }
 0x168   :  { %p446_p10 = pnand %p445_p9, %p439_p6 }
 0x18e   :  { %v240_v10 = vpop.f32.mrf.mxu0 }
 0x18f   :  { %v241_v11 = vadd.f32 %v330_v8, %v240_v10 }
 0x190   :  { %v347_v13 = vpop.f32.mrf.mxu0 }
 0x191   :  { %vm244_vm7 = vcmp.ge.f32.partialorder %v241_v11, 0.0  ;;  %v245_v14 = vmul.f32 0.01, %v241_v11 }
 0x193   :  { %v246_v15 = vsel %vm244_vm7, %v241_v11, %v245_v14 }
 0x194   :  { %v254_v16 = vrot.slane %v246_v15, %v253_v12 }
 0x196   :  { %v255_v17 = vcombine.high %v254_v16, %v254_v16  ;;  %v262_v18 = vrot.slane %v254_v16, %v253_v12 }
 0x198   :  { %v269_v19 = vrot.slane %v255_v17, %v253_v12  ;;  %v273_v20 = vrot.slane %v262_v18, %v272_v0 }
 0x19a   :  { %v277_v21 = vrot.slane %v269_v19, %v272_v0  ;;  %280 = vst [vmem:[#allocation9] sm:$0xff] %v273_v20 }
 0x19c   :  { %281 = vst [vmem:[#allocation9 + $0x8] sm:$0xff] %v277_v21 }
 0x19d   :  { %449 = shalt.err (!%p446_p10)
}
 0x19e   :  { %307 = dma.vmem_to_hbm [thread:$0]  %s302_s20, 256, %s564_s5, [#allocation5], %s468_s26, %s468_s26, %s469_s27  }
 0x19f   :  { %462 = dma.done.wait [#allocation5], 256  }
 0x1a0   :  { %463 = vsyncadd [#allocation5], 4294967040 }
 0x1a1   :  { %464 = dma.done.wait [#allocation11], 256  }
 0x1a2   :  { %465 = vsyncadd [#allocation11], 4294967040 }
 0x1a3   :  { %326 = vsyncpa [#allocation4], 1 }
 0x1a4   :  { %327 = vsyncpa [#allocation7], 1 }
 0x1a5   :  { %328 = vsyncpa [#allocation5], 1 }
 0x1a6   :  { %329 = vsyncpa [#allocation11], 1 }

</bundles_post_ra>
